<compile_context>
chip_gen: v7x
topology: tpu7x:2x2x1
jax: 0.10.0
libtpu: 0.0.40
codegen_flags: <defaults>
</compile_context>

<pallas_src>
import math
import functools

import jax
import jax.numpy as jnp
from jax.experimental import pallas as pl
from jax.experimental.pallas import tpu as pltpu

# ---- small, module-consistent hyperparameters -------------------------------
BATCH = 2
NUM_FRAMES = 8          # T
INPUT_DIM = 48          # input_dim
EMBED_DIM = 32          # embed_dim
NUM_HEADS = 4
HEAD_DIM = EMBED_DIM // NUM_HEADS
# dropout=0.1 in the module is inactive in eval/inference; not applied here.
# TODO(synk): training-mode attention dropout is not implemented (eval-mode forward only).


# ------------------------------- Pallas kernel -------------------------------
def _tar_kernel(B, T, Din, E, x_ref, w_ref, o_ref):
    """x_ref: (B*T, Din) activations; w_ref: packed weight slab; o_ref: (B, E)."""
    x = x_ref[...]                                                     # (B*T, Din) f32

    # Static slices of the packed slab (ref.at-style static views: free).
    r = 0
    w_xk = w_ref[r:r + Din, :]; r += Din                               # W_in @ W_k
    w_xv = w_ref[r:r + Din, :]; r += Din                               # W_in @ W_v
    w_o  = w_ref[r:r + E, :];   r += E                                 # (E, E)
    qbd  = w_ref[r:r + E, :];   r += E                                 # block-diag scaled query
    expm = w_ref[r:r + E, :];   r += E                                 # head -> channel expansion
    b_xk = w_ref[r:r + 1, :];   r += 1
    b_xv = w_ref[r:r + 1, :];   r += 1
    b_o  = w_ref[r:r + 1, :];   r += 1

    # K / V projections directly from x (input projection pre-folded in).
    k = jnp.dot(x, w_xk, preferred_element_type=jnp.float32) + b_xk    # (B*T, E)
    v = jnp.dot(x, w_xv, preferred_element_type=jnp.float32) + b_xv    # (B*T, E)

    # All-head attention scores in ONE matmul; 1/sqrt(head_dim) is pre-folded
    # into qbd.  Only the first NUM_HEADS lanes are meaningful; the remaining
    # zero columns yield a uniform softmax that expm's zero rows discard.
    s = jnp.dot(k, qbd, preferred_element_type=jnp.float32)            # (B*T, E)
    s = s.reshape(B, T, E)
    s = s - jnp.max(s, axis=1, keepdims=True)                          # softmax over frames
    p = jnp.exp(s)
    p = p * pl.reciprocal(jnp.sum(p, axis=1, keepdims=True), approx=True)

    # Expand per-head weights to per-channel weights (one matmul), apply to V,
    # reduce over frames -> per-batch refined feature.
    p_exp = jnp.dot(p.reshape(B * T, E), expm,
                    preferred_element_type=jnp.float32)                # (B*T, E)
    attn = jnp.sum((p_exp * v).reshape(B, T, E), axis=1)               # (B, E)

    # Output projection of the MHA, written as one lane-contiguous 2-D slab.
    o_ref[...] = jnp.dot(attn, w_o, preferred_element_type=jnp.float32) + b_o


# --------------------------- wrapper / pre-folding ----------------------------
def _pack_params(p, num_heads):
    """Algebraic pre-folding of module parameters into a single weight slab."""
    Din, E = p["w_in"].shape
    hd = E // num_heads

    # q projection is batch-independent; fold the attention scale into it.
    q = (p["q_tok"] @ p["w_q"] + p["b_q"]) / math.sqrt(hd)             # (1, E)

    # Block-diagonal scaled query (column h holds q_h in head-h rows) and the
    # head -> channel expansion matrix (row h is 1 over head-h channels).
    qbd = jnp.zeros((E, E), jnp.float32)
    expm = jnp.zeros((E, E), jnp.float32)
    for h in range(num_heads):
        sl = slice(h * hd, (h + 1) * hd)
        qbd = qbd.at[sl, h].set(q[0, sl])
        expm = expm.at[h, sl].set(1.0)

    # Fold the input projection into the K/V projections.
    w_xk = p["w_in"] @ p["w_k"]
    b_xk = p["b_in"] @ p["w_k"] + p["b_k"]
    w_xv = p["w_in"] @ p["w_v"]
    b_xv = p["b_in"] @ p["w_v"] + p["b_v"]

    slab = jnp.concatenate(
        [w_xk, w_xv, p["w_o"], qbd, expm, b_xk, b_xv, p["b_o"]], axis=0)
    pad = (-slab.shape[0]) % 8                                          # sublane-align rows
    if pad:
        slab = jnp.concatenate([slab, jnp.zeros((pad, E), jnp.float32)], axis=0)
    return slab, Din, E


def temporal_attention_refinement(x, params, num_heads=NUM_HEADS):
    """x: (B, T, D_in) float32 -> (B, E) float32."""
    B, T, Din = x.shape
    slab, slab_din, E = _pack_params(params, num_heads)
    assert slab_din == Din
    xf = x.reshape(B * T, Din)                                          # free, contiguous

    out = pl.pallas_call(
        functools.partial(_tar_kernel, B, T, Din, E),
        out_shape=jax.ShapeDtypeStruct((B, E), jnp.float32),
        grid_spec=pltpu.PrefetchScalarGridSpec(
            num_scalar_prefetch=0,
            grid=(1,),                                                  # whole batch in one step
            in_specs=[
                pl.BlockSpec((B * T, Din), lambda i: (0, 0)),           # activations
                pl.BlockSpec(slab.shape, lambda i: (0, 0)),             # packed weights (1 DMA)
            ],
            out_specs=pl.BlockSpec((B, E), lambda i: (0, 0)),           # 2-D lane-dense output
        ),
        compiler_params=pltpu.CompilerParams(dimension_semantics=("arbitrary",)),
    )(xf, slab)
    return out


# --------------------------- pure-JAX reference -------------------------------
def reference(x, p):
    xe = x @ p["w_in"] + p["b_in"]                                      # (B, T, E)
    q = p["q_tok"] @ p["w_q"] + p["b_q"]                                # (1, E)
    k = xe @ p["w_k"] + p["b_k"]
    v = xe @ p["w_v"] + p["b_v"]
    B, T, E = k.shape
    qh = jnp.broadcast_to(q, (B, 1, E)).reshape(B, 1, NUM_HEADS, HEAD_DIM).transpose(0, 2, 1, 3)
    kh = k.reshape(B, T, NUM_HEADS, HEAD_DIM).transpose(0, 2, 1, 3)
    vh = v.reshape(B, T, NUM_HEADS, HEAD_DIM).transpose(0, 2, 1, 3)
    s = jnp.einsum("bhqd,bhkd->bhqk", qh, kh) / math.sqrt(HEAD_DIM)
    a = jax.nn.softmax(s, axis=-1)
    o = jnp.einsum("bhqk,bhkd->bhqd", a, vh).transpose(0, 2, 1, 3).reshape(B, 1, E)
    return (o @ p["w_o"] + p["b_o"])[:, 0, :]


# ------------------------------- main ------------------------------------------
if __name__ == "__main__":
    key = jax.random.PRNGKey(0)
    keys = jax.random.split(key, 12)

    def init(k, shape, scale):
        return jax.random.normal(k, shape, dtype=jnp.float32) * scale

    # deterministic synthetic parameters (PyTorch weight shapes, pre-transposed
    # so all matmuls are plain `x @ W`)
    params = {
        "w_in": init(keys[0], (INPUT_DIM, EMBED_DIM), 1.0 / math.sqrt(INPUT_DIM)),
        "b_in": init(keys[1], (1, EMBED_DIM), 0.02),
        "q_tok": init(keys[2], (1, EMBED_DIM), 1.0),          # nn.Parameter(randn(1,1,E))
        "w_q": init(keys[3], (EMBED_DIM, EMBED_DIM), 1.0 / math.sqrt(EMBED_DIM)),
        "b_q": init(keys[4], (1, EMBED_DIM), 0.02),
        "w_k": init(keys[5], (EMBED_DIM, EMBED_DIM), 1.0 / math.sqrt(EMBED_DIM)),
        "b_k": init(keys[6], (1, EMBED_DIM), 0.02),
        "w_v": init(keys[7], (EMBED_DIM, EMBED_DIM), 1.0 / math.sqrt(EMBED_DIM)),
        "b_v": init(keys[8], (1, EMBED_DIM), 0.02),
        "w_o": init(keys[9], (EMBED_DIM, EMBED_DIM), 1.0 / math.sqrt(EMBED_DIM)),
        "b_o": init(keys[10], (1, EMBED_DIM), 0.02),
    }

    x = jax.random.normal(keys[11], (BATCH, NUM_FRAMES, INPUT_DIM), dtype=jnp.float32)

    out = jax.block_until_ready(temporal_attention_refinement(x, params))
    ref = jax.block_until_ready(reference(x, params))

    assert out.shape == (BATCH, EMBED_DIM), out.shape
    # tolerance relaxed slightly vs 1e-4: the kernel uses the EUP approximate
    # reciprocal for the softmax denominator (and algebraically pre-folded
    # weights), which perturbs results at the ~1e-4 level.
    assert jnp.allclose(out, ref, atol=2e-3, rtol=2e-3), float(jnp.max(jnp.abs(out - ref)))
    print("KERNEL_OK")
</pallas_src>

<mosaic_0001>
module attributes {stable_mosaic.version = 11 : i64} {
  func.func @_tar_kernel(%arg0: i32, %arg1: memref<16x48xf32, #tpu.memory_space<vmem>>, %arg2: memref<200x32xf32, #tpu.memory_space<vmem>>, %arg3: memref<2x32xf32, #tpu.memory_space<vmem>>) attributes {dimension_semantics = [#tpu.dimension_semantics<arbitrary>], iteration_bounds = array<i64: 1>, scalar_prefetch = 0 : i64, scratch_operands = 0 : i64, tpu.core_type = #tpu.core_type<tc>, window_params = [{pipeline_mode = #tpu.pipeline_mode<synchronous>, transform_indices = @transform_0, window_bounds = array<i64: 16, 48>}, {pipeline_mode = #tpu.pipeline_mode<synchronous>, transform_indices = @transform_1, window_bounds = array<i64: 200, 32>}, {pipeline_mode = #tpu.pipeline_mode<synchronous>, transform_indices = @transform_2, window_bounds = array<i64: 2, 32>}]} {
    %c0 = arith.constant 0 : index
    %c0_0 = arith.constant 0 : index
    %0 = vector.load %arg1[%c0, %c0_0] : memref<16x48xf32, #tpu.memory_space<vmem>>, vector<16x48xf32>
    %c0_1 = arith.constant 0 : index
    %c0_2 = arith.constant 0 : index
    %1 = vector.load %arg2[%c0_1, %c0_2] : memref<200x32xf32, #tpu.memory_space<vmem>>, vector<48x32xf32>
    %c48 = arith.constant 48 : index
    %c0_3 = arith.constant 0 : index
    %2 = vector.load %arg2[%c48, %c0_3] : memref<200x32xf32, #tpu.memory_space<vmem>>, vector<48x32xf32>
    %c96 = arith.constant 96 : index
    %c0_4 = arith.constant 0 : index
    %3 = vector.load %arg2[%c96, %c0_4] : memref<200x32xf32, #tpu.memory_space<vmem>>, vector<32x32xf32>
    %c128 = arith.constant 128 : index
    %c0_5 = arith.constant 0 : index
    %4 = vector.load %arg2[%c128, %c0_5] : memref<200x32xf32, #tpu.memory_space<vmem>>, vector<32x32xf32>
    %c160 = arith.constant 160 : index
    %c0_6 = arith.constant 0 : index
    %5 = vector.load %arg2[%c160, %c0_6] : memref<200x32xf32, #tpu.memory_space<vmem>>, vector<32x32xf32>
    %c192 = arith.constant 192 : index
    %c0_7 = arith.constant 0 : index
    %6 = vector.load %arg2[%c192, %c0_7] : memref<200x32xf32, #tpu.memory_space<vmem>>, vector<1x32xf32>
    %c193 = arith.constant 193 : index
    %c0_8 = arith.constant 0 : index
    %7 = vector.load %arg2[%c193, %c0_8] : memref<200x32xf32, #tpu.memory_space<vmem>>, vector<1x32xf32>
    %c194 = arith.constant 194 : index
    %c0_9 = arith.constant 0 : index
    %8 = vector.load %arg2[%c194, %c0_9] : memref<200x32xf32, #tpu.memory_space<vmem>>, vector<1x32xf32>
    %cst = arith.constant dense<0.000000e+00> : vector<16x32xf32>
    %9 = tpu.matmul %0, %1, %cst {dimension_numbers = #tpu.dot_dimension_numbers<[1], [0], [0], [1], [0, 0, 1, 1], [], []>} : vector<16x48xf32>, vector<48x32xf32>, vector<16x32xf32> -> vector<16x32xf32>
    %10 = vector.broadcast %6 : vector<1x32xf32> to vector<16x32xf32>
    %11 = arith.addf %9, %10 : vector<16x32xf32>
    %cst_10 = arith.constant dense<0.000000e+00> : vector<16x32xf32>
    %12 = tpu.matmul %0, %2, %cst_10 {dimension_numbers = #tpu.dot_dimension_numbers<[1], [0], [0], [1], [0, 0, 1, 1], [], []>} : vector<16x48xf32>, vector<48x32xf32>, vector<16x32xf32> -> vector<16x32xf32>
    %13 = vector.broadcast %7 : vector<1x32xf32> to vector<16x32xf32>
    %14 = arith.addf %12, %13 : vector<16x32xf32>
    %cst_11 = arith.constant dense<0.000000e+00> : vector<16x32xf32>
    %15 = tpu.matmul %11, %4, %cst_11 {dimension_numbers = #tpu.dot_dimension_numbers<[1], [0], [0], [1], [0, 0, 1, 1], [], []>} : vector<16x32xf32>, vector<32x32xf32>, vector<16x32xf32> -> vector<16x32xf32>
    %16 = vector.shape_cast %15 : vector<16x32xf32> to vector<2x8x32xf32>
    %cst_12 = arith.constant dense<0xFF800000> : vector<2x32xf32>
    %17 = vector.multi_reduction <maximumf>, %16, %cst_12 [1] : vector<2x8x32xf32> to vector<2x32xf32>
    %18 = vector.shape_cast %17 : vector<2x32xf32> to vector<2x1x32xf32>
    %19 = vector.broadcast %18 : vector<2x1x32xf32> to vector<2x8x32xf32>
    %20 = arith.subf %16, %19 : vector<2x8x32xf32>
    %21 = math.exp %20 : vector<2x8x32xf32>
    %cst_13 = arith.constant dense<0.000000e+00> : vector<2x32xf32>
    %22 = vector.multi_reduction <add>, %21, %cst_13 [1] : vector<2x8x32xf32> to vector<2x32xf32>
    %23 = vector.shape_cast %22 : vector<2x32xf32> to vector<2x1x32xf32>
    %24 = tpu.reciprocal %23 {approx = true} : vector<2x1x32xf32> -> vector<2x1x32xf32>
    %25 = vector.broadcast %24 : vector<2x1x32xf32> to vector<2x8x32xf32>
    %26 = arith.mulf %21, %25 : vector<2x8x32xf32>
    %27 = vector.shape_cast %26 : vector<2x8x32xf32> to vector<16x32xf32>
    %cst_14 = arith.constant dense<0.000000e+00> : vector<16x32xf32>
    %28 = tpu.matmul %27, %5, %cst_14 {dimension_numbers = #tpu.dot_dimension_numbers<[1], [0], [0], [1], [0, 0, 1, 1], [], []>} : vector<16x32xf32>, vector<32x32xf32>, vector<16x32xf32> -> vector<16x32xf32>
    %29 = arith.mulf %28, %14 : vector<16x32xf32>
    %30 = vector.shape_cast %29 : vector<16x32xf32> to vector<2x8x32xf32>
    %cst_15 = arith.constant dense<0.000000e+00> : vector<2x32xf32>
    %31 = vector.multi_reduction <add>, %30, %cst_15 [1] : vector<2x8x32xf32> to vector<2x32xf32>
    %cst_16 = arith.constant dense<0.000000e+00> : vector<2x32xf32>
    %32 = tpu.matmul %31, %3, %cst_16 {dimension_numbers = #tpu.dot_dimension_numbers<[1], [0], [0], [1], [0, 0, 1, 1], [], []>} : vector<2x32xf32>, vector<32x32xf32>, vector<2x32xf32> -> vector<2x32xf32>
    %33 = vector.broadcast %8 : vector<1x32xf32> to vector<2x32xf32>
    %34 = arith.addf %32, %33 : vector<2x32xf32>
    %c0_17 = arith.constant 0 : index
    %c0_18 = arith.constant 0 : index
    %35 = vector.load %arg3[%c0_17, %c0_18] : memref<2x32xf32, #tpu.memory_space<vmem>>, vector<2x32xf32>
    tpu.vector_store %arg3[%c0_17, %c0_18], %34 {strides = array<i32>} : memref<2x32xf32, #tpu.memory_space<vmem>>, vector<2x32xf32>,
    return
  }
  func.func @transform_0(%arg0: i32) -> (i32, i32) {
    %c0_i32 = arith.constant 0 : i32
    %c0_i32_0 = arith.constant 0 : i32
    %c0_i32_1 = arith.constant 0 : i32
    return %c0_i32, %c0_i32_0 : i32, i32
  }
  func.func @transform_1(%arg0: i32) -> (i32, i32) {
    %c0_i32 = arith.constant 0 : i32
    %c0_i32_0 = arith.constant 0 : i32
    %c0_i32_1 = arith.constant 0 : i32
    return %c0_i32, %c0_i32_0 : i32, i32
  }
  func.func @transform_2(%arg0: i32) -> (i32, i32) {
    %c0_i32 = arith.constant 0 : i32
    %c0_i32_0 = arith.constant 0 : i32
    %c0_i32_1 = arith.constant 0 : i32
    return %c0_i32, %c0_i32_0 : i32, i32
  }
}

</mosaic_0001>

<bundles_post_ra>
// kernel: tpu_custom_call.1
= control target key start
LH: loop header
LB: loop body
LE: loop exit
PB: predicated region body
PF: predicated region fallthrough
CT: control target
= control target key end

     0   :  { %vm45_vm0 = vcmask 392192   ;;  %s842_s0 = inlined_call_operand.vmem [shape: f32[16,48], index: 0, kind: input, shape index: {}]   ;;  %s843_s1 = inlined_call_operand.vmem [shape: f32[200,32], index: 1, kind: input, shape index: {}]   ;;  %s844_s2 = inlined_call_operand.hbm [shape: f32[2,32], index: 2, kind: output, shape index: {}]  }
   0x1   :  { %v14_v0 = vld [vmem:[%s843_s1] sm:$0xff]  ;;  %v15_v1 = vld [vmem:[%s843_s1 + $0x8] sm:$0xff]  ;;  %v16_v2 = vld [vmem:[%s843_s1 + $0x10] sm:$0xff] }
   0x2   :  { %v627_v3 = vpack.c.bf16 %v15_v1, %v14_v0  ;;  %v17_v4 = vld [vmem:[%s843_s1 + $0x18] sm:$0xff]  ;;  %v18_v6 = vld [vmem:[%s843_s1 + $0x20] sm:$0xff]  ;;  %v19_v7 = vld [vmem:[%s843_s1 + $0x28] sm:$0xff] }
   0x3   :  { %v631_v5 = vpack.c.bf16 %v17_v4, %v16_v2  ;;  %v12_v8 = vld [vmem:[%s842_s0] sm:$0xff] }
   0x4   :  { %628 = vmatprep.subr.bf16.mxu0 %v627_v3  ;;  %576 = vmatprep.mubr.msk.f32.mxu0 %vm45_vm0, %v12_v8 }
   0x5   :  { %7 = vsyncpa [#allocation3], 0  ;;  %630 = vmatpush3.bf16.msra.mxu0 %v627_v3  ;;  %591 = vmatprep.mubr.msk.f32.mxu1 %vm45_vm0, %v12_v8  ;;  %v635_v9 = vpack.c.bf16 %v19_v7, %v18_v6  ;;  %v30_v10 = vld [vmem:[%s843_s1 + $0x80] sm:$0xff]  ;;  %v31_v11 = vld [vmem:[%s843_s1 + $0x88] sm:$0xff]  ;;  %vm206_vm1 = vcmask 261120   ;;  %vm710_vm2 = vmmov 0  }
   0x6   :  { %632 = vmatprep.subr.bf16.mxu0 %v631_v5  ;;  %v651_v12 = vpack.c.bf16 %v31_v11, %v30_v10  ;;  %v13_v13 = vld [vmem:[%s842_s0 + $0x8] sm:$0xff]  ;;  %v32_v14 = vld [vmem:[%s843_s1 + $0x90] sm:$0xff]  ;;  %v33_v15 = vld [vmem:[%s843_s1 + $0x98] sm:$0xff]  ;;  %vm429_vm3 = vcmask 1041409   ;;  %s712_s9 = smov [#allocation2]   ;;  %vm503_vm4 = vcmask 254976  }
   0x7   :  { %v655_v16 = vpack.c.bf16 %v33_v15, %v32_v14  ;;  %v519_v17 = vld [vmem:[%s843_s1 + $0xc0] ss:$0 sm:$0xff]  ;;  %v20_v22 = vld [vmem:[%s843_s1 + $0x30] sm:$0xff]  ;;  %v21_v23 = vld [vmem:[%s843_s1 + $0x38] sm:$0xff]  ;;  %s511_s10 = sshll.u32 %s712_s9, 4  ;;  %s512_s10 = int_to_ptr.vmem [resolvable:$true] %s511_s10 }
   0x8   :  { %v639_v24 = vpack.c.bf16 %v21_v23, %v20_v22  ;;  %v22_v25 = vld [vmem:[%s843_s1 + $0x40] sm:$0xff]  ;;  %v23_v26 = vld [vmem:[%s843_s1 + $0x48] sm:$0xff]  ;;  %v24_v28 = vld [vmem:[%s843_s1 + $0x50] sm:$0xff]  ;;  %v711_v22 = vmov 0.0   ;;  %s685_s11 = scalar_lea.vmem %s512_s10, 32  ;;  %p690_p1 = scmp.lt.s32.totalorder %s512_s10, %s512_s10 }
   0x9   :  { %634 = vmatpush3.bf16.msra.mxu0 %v631_v5  ;;  %v643_v27 = vpack.c.bf16 %v23_v26, %v22_v25  ;;  %v25_v29 = vld [vmem:[%s843_s1 + $0x58] sm:$0xff]  ;;  %v34_v30 = vld [vmem:[%s843_s1 + $0xa0] sm:$0xff]  ;;  %v35_v32 = vld [vmem:[%s843_s1 + $0xa8] sm:$0xff]  ;;  %p686_p0 = scmp.ne.s32.totalorder %s512_s10, %s685_s11  ;;  %p691_p2 = scmp.lt.s32.totalorder %s685_s11, %s685_s11 }
   0xa   :  { %636 = vmatprep.subr.bf16.mxu0 %v635_v9  ;;  %640 = vmatprep.subr.bf16.mxu1 %v639_v24  ;;  %v647_v31 = vpack.c.bf16 %v25_v29, %v24_v28  ;;  %v659_v33 = vpack.c.bf16 %v35_v32, %v34_v30  ;;  %v36_v34 = vld [vmem:[%s843_s1 + $0xb0] sm:$0xff]  ;;  %v37_v35 = vld [vmem:[%s843_s1 + $0xb8] sm:$0xff]  ;;  %v26_v15 = vld [vmem:[%s843_s1 + $0x60] sm:$0xff] }
   0xb   :  { %642 = vmatpush3.bf16.msra.mxu1 %v639_v24  ;;  %v663_v36 = vpack.c.bf16 %v37_v35, %v36_v34  ;;  %v522_v23 = vld [vmem:[%s843_s1 + $0xc1] ss:$0 sm:$0xff]  ;;  %p692_p3 = por %p691_p2, %p690_p1 }
   0xc   :  { %644 = vmatprep.subr.bf16.mxu1 %v643_v27 }
   0xd   :  { %638 = vmatpush3.bf16.msra.mxu0 %v635_v9  ;;  %p693_p4 = pnand %p692_p3, %p686_p0 }
   0xe   :  { %652 = vmatprep.subr.bf16.mxu0 %v651_v12 }
   0xf   :  { %646 = vmatpush3.bf16.msra.mxu1 %v643_v27 }
  0x10   :  { %577 = vmatmul.mubr.msk.f32.vlgmr.msra.gmra.mrb[0].mxu0 %vm45_vm0, %v13_v13  ;;  %648 = vmatprep.subr.bf16.mxu1 %v647_v31 }
  0x11   :  { %654 = vmatpush3.bf16.msra.mxu0 %v651_v12 }
  0x12   :  { %656 = vmatprep.subr.bf16.mxu0 %v655_v16 }
  0x13   :  { %650 = vmatpush3.bf16.msra.mxu1 %v647_v31 }
  0x14   :  { %660 = vmatprep.subr.bf16.mxu1 %v659_v33 }
  0x15   :  { %658 = vmatpush3.bf16.msra.mxu0 %v655_v16  ;;  %v27_v16 = vld [vmem:[%s843_s1 + $0x68] sm:$0xff] }
  0x16   :  { %592 = vmatmul.mubr.msk.f32.vlgmr.msra.gmra.mrb[0].mxu1 %vm45_vm0, %v13_v13 }
  0x17   :  { %662 = vmatpush3.bf16.msra.mxu1 %v659_v33 }
  0x18   :  { %664 = vmatprep.subr.bf16.mxu1 %v663_v36 }
  0x1b   :  { %666 = vmatpush3.bf16.msra.mxu1 %v663_v36 }
  0xe3   :  { %v578_v18 = vpop.f32.mrb[0].mxu0 }
  0xe4   :  { %v118_v19 = vpop.f32.mrb[1].mxu0  ;;  %v124_v21 = vadd.f32 %v578_v18, %v519_v17  ;;  %v709_v18 = vmov 0.0|0.0  }
  0xe5   :  { %v119_v20 = vadd.f32 %v519_v17, %v118_v19  ;;  %v668_v17 = vpack.c.bf16 %v27_v16, %v26_v15  ;;  %667 = vmatprep.subr.bf16.mxu0 %v709_v18  ;;  %v28_v19 = vld [vmem:[%s843_s1 + $0x70] sm:$0xff] }
  0xe7   :  { %602 = vmatprep.mubr.msk.f32.mxu0 %vm206_vm1, %v119_v20  ;;  %v29_v20 = vld [vmem:[%s843_s1 + $0x78] sm:$0xff] }
  0xe8   :  { %603 = vmatmul.mubr.msk.f32.vlgmr.msra.gmra.mrb[2].mxu0 %vm206_vm1, %v124_v21  ;;  %v671_v21 = vpack.c.bf16 %v29_v20, %v28_v19 }
  0xe9   :  { %v593_v13 = vpop.f32.mrb[0].mxu1  ;;  %669 = vmatpush3.bf16.msra.mxu0 %v668_v17  ;;  %624 = vmatprep.mubr.msk.f32.mxu0 %vm710_vm2, %v711_v22 }
  0xea   :  { %v197_v14 = vpop.f32.mrb[1].mxu1  ;;  %670 = vmatprep.subr.bf16.mxu0 %v709_v18  ;;  %v203_v24 = vadd.f32 %v593_v13, %v522_v23 }
  0xeb   :  { %v198_v25 = vadd.f32 %v522_v23, %v197_v14 }
  0xed   :  { %672 = vmatpush3.bf16.msra.mxu0 %v671_v21 }
 0x1bb   :  { %v604_v37 = vpop.f32.mrb[2].mxu0 }
 0x1bc   :  { %v295_v38 = vsel %vm206_vm1, %v604_v37, -inf  ;;  %v279_v39 = vpop.f32.mrb[3].mxu0 }
 0x1bd   :  { %v296_v40 = vrot.slane %v295_v38, 4  ;;  %v288_v41 = vsel %vm206_vm1, %v279_v39, -inf }
 0x1be   :  { %v289_v42 = vrot.slane %v288_v41, 4 }
 0x1bf   :  { %v297_v43 = vmax.f32 %v295_v38, %v296_v40 }
 0x1c0   :  { %v290_v44 = vmax.f32 %v288_v41, %v289_v42 }
 0x1c1   :  { %v298_v45 = vrot.slane %v297_v43, 2 }
 0x1c2   :  { %v291_v46 = vrot.slane %v290_v44, 2 }
 0x1c3   :  { %v299_v47 = vmax.f32 %v297_v43, %v298_v45  ;;  %v529_v45 = vld [vmem:[%s843_s1 + $0xc2] ss:$0 sm:$0xff] }
 0x1c4   :  { %v292_v48 = vmax.f32 %v290_v44, %v291_v46 }
 0x1c5   :  { %v300_v49 = vrot.slane %v299_v47, 1 }
 0x1c6   :  { %v293_v50 = vrot.slane %v292_v48, 1 }
 0x1c7   :  { %v301_v51 = vmax.f32 %v299_v47, %v300_v49 }
 0x1c8   :  { %v294_v52 = vmax.f32 %v292_v48, %v293_v50 }
 0x1c9   :  { %v303_v53 = vsub.f32 %v604_v37, %v301_v51 }
 0x1ca   :  { %v302_v54 = vsub.f32 %v279_v39, %v294_v52 }
 0x1cb   :  { %v306_v55 = vmul.f32 1.442695, %v303_v53 }
 0x1cc   :  { %v304_v56 = vmul.f32 1.442695, %v302_v54 }
 0x1cd   :  { %677 = vpow2.f32 %v306_v55 }
 0x1ce   :  { %679 = vpow2.f32 %v304_v56 }
 0x1d7   :  { %v678_v57 = vpop.eup %677 }
 0x1d8   :  { %v680_v58 = vpop.eup %679  ;;  %v315_v59 = vsel %vm206_vm1, %v678_v57, 0.0 }
 0x1d9   :  { %v316_v60 = vrot.slane %v315_v59, 4  ;;  %v308_v61 = vsel %vm206_vm1, %v680_v58, 0.0 }
 0x1da   :  { %v309_v62 = vrot.slane %v308_v61, 4 }
 0x1db   :  { %v317_v63 = vadd.f32 %v316_v60, %v315_v59 }
 0x1dc   :  { %v310_v0 = vadd.f32 %v309_v62, %v308_v61 }
 0x1dd   :  { %v318_v1 = vrot.slane %v317_v63, 2 }
 0x1de   :  { %v311_v2 = vrot.slane %v310_v0, 2 }
 0x1df   :  { %v319_v3 = vadd.f32 %v318_v1, %v317_v63 }
 0x1e0   :  { %v312_v4 = vadd.f32 %v311_v2, %v310_v0 }
 0x1e1   :  { %v320_v5 = vrot.slane %v319_v3, 1 }
 0x1e2   :  { %v313_v6 = vrot.slane %v312_v4, 1 }
 0x1e3   :  { %v321_v7 = vadd.f32 %v320_v5, %v319_v3 }
 0x1e4   :  { %v314_v8 = vadd.f32 %v313_v6, %v312_v4 }
 0x1e5   :  { %681 = vrcp.f32 %v321_v7 }
 0x1e6   :  { %683 = vrcp.f32 %v314_v8 }
 0x1ef   :  { %v682_v9 = vpop.eup %681 }
 0x1f0   :  { %v684_v10 = vpop.eup %683  ;;  %v325_v12 = vmul.f32 %v682_v9, %v678_v57 }
 0x1f1   :  { %v324_v11 = vmul.f32 %v684_v10, %v680_v58 }
 0x1f3   :  { %613 = vmatprep.mubr.msk.f32.mxu1 %vm206_vm1, %v324_v11 }
 0x1f4   :  { %614 = vmatmul.mubr.msk.f32.vlgmr.msra.gmra.mrb[2].mxu1 %vm206_vm1, %v325_v12 }
 0x2c7   :  { %v615_v26 = vpop.f32.mrb[2].mxu1 }
 0x2c8   :  { %v408_v27 = vmul.f32 %v615_v26, %v203_v24  ;;  %v398_v28 = vpop.f32.mrb[3].mxu1 }
 0x2c9   :  { %v407_v29 = vmul.f32 %v398_v28, %v198_v25 }
 0x2ca   :  { %v416_v30 = vsel %vm206_vm1, %v408_v27, 0.0 }
 0x2cb   :  { %v417_v31 = vrot.slane %v416_v30, 4  ;;  %v409_v32 = vsel %vm206_vm1, %v407_v29, 0.0 }
 0x2cc   :  { %v410_v33 = vrot.slane %v409_v32, 4 }
 0x2cd   :  { %v418_v34 = vadd.f32 %v417_v31, %v416_v30 }
 0x2ce   :  { %v411_v35 = vadd.f32 %v410_v33, %v409_v32 }
 0x2cf   :  { %v419_v36 = vrot.slane %v418_v34, 2 }
 0x2d0   :  { %v412_v37 = vrot.slane %v411_v35, 2 }
 0x2d1   :  { %v420_v38 = vadd.f32 %v419_v36, %v418_v34 }
 0x2d2   :  { %v413_v39 = vadd.f32 %v412_v37, %v411_v35 }
 0x2d3   :  { %v421_v40 = vrot.slane %v420_v38, 1 }
 0x2d4   :  { %v414_v41 = vrot.slane %v413_v39, 1 }
 0x2d5   :  { %v422_v42 = vadd.f32 %v421_v40, %v420_v38 }
 0x2d6   :  { %v415_v43 = vadd.f32 %v414_v41, %v413_v39 }
 0x2d8   :  { %v430_v44 = vsel %vm429_vm3, %v422_v42, %v415_v43 }
 0x2d9   :  { %625 = vmatmul.mubr.msk.f32.vlgmr.msra.gmra.mrb[4].mxu0 %vm206_vm1, %v430_v44 }
 0x3ac   :  { %v499_v46 = vpop.f32.mrb[4].mxu0 }
 0x3ad   :  { %v500_v47 = vadd.f32 %v529_v45, %v499_v46  ;;  %v626_v48 = vpop.f32.mrb[5].mxu0 }
 0x3af   :  { %504 = vst.msk [vmem:[#allocation2] sm:$0x3] %vm503_vm4, %v500_v47 }
 0x3b0   :  { %696 = shalt.err (!%p693_p4)
}
 0x3b1   :  { %s697_s14 = scalar_lea.hbm %s844_s2, 32 }
 0x3b2   :  { %p698_p5 = scmp.ne.s32.totalorder %s844_s2, %s697_s14  ;;  %p701_p6 = scmp.lt.u32.totalorder %s697_s14, %s844_s2 }
 0x3b4   :  { %p703_p7 = pnand %p701_p6, %p698_p5 }
 0x3b6   :  { %706 = shalt.err (!%p703_p7)
}
 0x3b7   :  { %514 = dma.vmem_to_hbm [thread:$0]  %s512_s10, 32, %s844_s2, [#allocation3]  }
 0x3b8   :  { %707 = dma.done.wait [#allocation3], 32  }
 0x3b9   :  { %708 = vsyncadd [#allocation3], 4294967264 }
 0x3ba   :  { %518 = vsyncpa [#allocation3], 1 }

</bundles_post_ra>
